<compile_context>
chip_gen: v7x
topology: tpu7x:2x2x1
jax: 0.10.0
libtpu: 0.0.40
codegen_flags: <defaults>
</compile_context>

<pallas_src>
import functools

import jax
import jax.numpy as jnp
from jax.experimental import pallas as pl
from jax.experimental.pallas import tpu as pltpu

LANE = 128
SUBLANE = 8
HID1, HID2 = 128, 64


def _round_up(x, m):
    return ((x + m - 1) // m) * m


# ----------------------------------------------------------------------------- kernels
def _mlp_kernel(x_ref, w1_ref, b1_ref, w2_ref, b2_ref, w3_ref, b3_ref, o_ref):
    """Fused Linear -> ReLU -> Linear -> ReLU -> Linear (f32 accumulation on the MXU)."""
    x = x_ref[...]
    h1 = jnp.dot(x, w1_ref[...], preferred_element_type=jnp.float32) + b1_ref[...]
    h1 = jnp.maximum(h1, 0.0)
    h2 = jnp.dot(h1.astype(w2_ref.dtype), w2_ref[...],
                 preferred_element_type=jnp.float32) + b2_ref[...]
    h2 = jnp.maximum(h2, 0.0)
    out = jnp.dot(h2.astype(w3_ref.dtype), w3_ref[...],
                  preferred_element_type=jnp.float32) + b3_ref[...]
    o_ref[...] = out.astype(o_ref.dtype)


def _mlp_score_kernel(x_ref, w1_ref, b1_ref, w2_ref, b2_ref, w3_ref, b3_ref,
                      venc_t_ref, o_ref):
    """Fused xi-encoder MLP + critic score matmul: o = MLP(x) @ v_enc.T.

    v_enc.T is a constant-index-map resident input, so the (lane-padded) xi encoding
    never needs to be written back to HBM.
    """
    x = x_ref[...]
    h1 = jnp.dot(x, w1_ref[...], preferred_element_type=jnp.float32) + b1_ref[...]
    h1 = jnp.maximum(h1, 0.0)
    h2 = jnp.dot(h1.astype(w2_ref.dtype), w2_ref[...],
                 preferred_element_type=jnp.float32) + b2_ref[...]
    h2 = jnp.maximum(h2, 0.0)
    xi = jnp.dot(h2.astype(w3_ref.dtype), w3_ref[...],
                 preferred_element_type=jnp.float32) + b3_ref[...]
    scores = jnp.dot(xi.astype(venc_t_ref.dtype), venc_t_ref[...],
                     preferred_element_type=jnp.float32)
    o_ref[...] = scores.astype(o_ref.dtype)


# ------------------------------------------------------------------- device-aware plan
@functools.lru_cache(maxsize=1)
def _device_plan():
    """(num_tensorcores, vmem_limit_bytes) for the local chip generation."""
    kind = ""
    try:
        kind = jax.devices()[0].device_kind.lower()
    except Exception:
        pass
    n_cores = 2 if ("v7" in kind or "7x" in kind) else 1       # v7x has 2 TCs/chip
    try:
        vmem_cap = int(pltpu.get_tpu_info().vmem_capacity_bytes)
    except Exception:
        # fallback: v7x has 64 MiB per TC, v5e/v6e 128 MiB
        vmem_cap = (64 if n_cores == 2 else 128) * 1024 * 1024
    # leave headroom below physical VMEM for compiler scratch / resident weights
    vmem_limit = max(32 * 1024 * 1024, min(vmem_cap * 3 // 4, 64 * 1024 * 1024))
    return n_cores, vmem_limit


def _choose_block_batch(n_rows, bytes_per_row, n_cores, budget_bytes, row_align,
                        cap=4096):
    """Largest row tile that fits the VMEM budget (cap 4096 rows).

    Single maximal tile on 1-TC chips (v5e/v6e: the grid is a sequential loop, fewer
    steps = less fixed overhead); >= 2 tiles on v7x once there are enough rows to keep
    both TensorCores busy (grid axis is marked 'parallel')."""
    max_rows = max(row_align, budget_bytes // max(bytes_per_row, 1))
    bb = min(cap, int(max_rows))
    n_rows_al = _round_up(max(n_rows, 1), row_align)
    if n_cores >= 2 and n_rows >= 256:
        bb = min(bb, _round_up(pl.cdiv(n_rows_al, 2), row_align))
    bb = min(bb, n_rows_al)
    return max(row_align, (bb // row_align) * row_align)


# -------------------------------------------------------------------- pallas_call glue
def _fused_call(kernel_fn, x, resident, out_cols, *, f32_work_cols,
                out_dtype=jnp.float32):
    """Run `kernel_fn` over row tiles of x with `resident` arrays held in VMEM
    (constant index maps). Returns (n_rows, out_cols)."""
    n_rows, f_in = x.shape
    n_cores, vmem_limit = _device_plan()
    itemsize = jnp.dtype(x.dtype).itemsize
    # bf16 packs 2 rows per sublane -> 16-row alignment; int8/fp8 -> 32
    row_align = SUBLANE if itemsize >= 4 else (16 if itemsize == 2 else 32)

    resident_bytes = sum(2 * a.size * jnp.dtype(a.dtype).itemsize for a in resident)
    budget = max(vmem_limit // 2 - resident_bytes, 1 << 20)
    # double-buffered x & out tiles + f32 intermediates per row
    bytes_per_row = (2 * f_in * itemsize
                     + 2 * out_cols * jnp.dtype(out_dtype).itemsize
                     + f32_work_cols * 4)
    bb = _choose_block_batch(n_rows, bytes_per_row, n_cores, budget, row_align)

    n_pad = _round_up(n_rows, bb)
    if n_pad != n_rows:
        x = jnp.pad(x, ((0, n_pad - n_rows), (0, 0)))
    grid = (n_pad // bb,)

    def const_spec(a):
        nd = a.ndim
        return pl.BlockSpec(a.shape, lambda i, _nd=nd: (0,) * _nd)

    out = pl.pallas_call(
        kernel_fn,
        out_shape=jax.ShapeDtypeStruct((n_pad, out_cols), out_dtype),
        grid_spec=pltpu.PrefetchScalarGridSpec(
            num_scalar_prefetch=0,
            grid=grid,
            in_specs=[pl.BlockSpec((bb, f_in), lambda i: (i, 0))]
                     + [const_spec(a) for a in resident],
            out_specs=pl.BlockSpec((bb, out_cols), lambda i: (i, 0)),
        ),
        compiler_params=pltpu.CompilerParams(
            dimension_semantics=("parallel",),
            vmem_limit_bytes=vmem_limit,
        ),
    )(x, *resident)
    return out[:n_rows]


# ------------------------------------------------------------------- parameter helpers
def _init_linear(key, fan_in, fan_out):
    kw, kb = jax.random.split(key)
    bound = 1.0 / jnp.sqrt(fan_in)
    w = jax.random.uniform(kw, (fan_in, fan_out), jnp.float32, -bound, bound)
    b = jax.random.uniform(kb, (1, fan_out), jnp.float32, -bound, bound)
    return w, b


def init_encoder_params(key, in_dim, out_dim):
    dims = [(in_dim, HID1), (HID1, HID2), (HID2, out_dim)]
    params = {}
    for idx, (fi, fo) in enumerate(dims, start=1):
        key, sub = jax.random.split(key)
        w, b = _init_linear(sub, fi, fo)
        params[f"w{idx}"], params[f"b{idx}"] = w, b
    return params


def init_downward_smile_params(key, V_dim, critic_output_dim, feature_num):
    kv, kx = jax.random.split(key)
    return {
        "v_encoder": init_encoder_params(kv, V_dim, critic_output_dim),
        "xi_encoder": init_encoder_params(kx, feature_num + 1, critic_output_dim),
    }


def _prepare_encoder(p, v_lane, compute_dtype):
    """Pad the final projection to a lane multiple (zero pad -> extra columns are
    exactly 0) and optionally cast weights to the compute dtype. Done once per call
    chain, not per feature. Biases stay f32 (f32 accumulation)."""
    w1, w2, w3 = p["w1"], p["w2"], p["w3"]
    b1, b2, b3 = p["b1"], p["b2"], p["b3"]
    V = w3.shape[1]
    if v_lane != V:
        w3 = jnp.pad(w3, ((0, 0), (0, v_lane - V)))
        b3 = jnp.pad(b3, ((0, 0), (0, v_lane - V)))
    if compute_dtype is not None:
        w1 = w1.astype(compute_dtype)
        w2 = w2.astype(compute_dtype)
        w3 = w3.astype(compute_dtype)
    return (w1, b1.astype(jnp.float32), w2, b2.astype(jnp.float32),
            w3, b3.astype(jnp.float32))


# ------------------------------------------------------------------ encoder / score ops
def _encoder_forward_padded(x, prepared_weights, v_lane, compute_dtype):
    if compute_dtype is not None:
        x = x.astype(compute_dtype)
    return _fused_call(_mlp_kernel, x, list(prepared_weights), v_lane,
                       f32_work_cols=HID1 + HID2 + v_lane)


def mlp_encoder_forward(x, params, *, compute_dtype=None):
    """Standalone fused 3-layer MLP encoder: (B, F) -> (B, critic_out), f32."""
    V = params["w3"].shape[1]
    v_lane = _round_up(V, LANE)
    weights = _prepare_encoder(params, v_lane, compute_dtype)
    return _encoder_forward_padded(x, weights, v_lane, compute_dtype)[:, :V]


def _scores_from_padded_venc(x_rows, xi_weights, v_enc_pad, v_lane, compute_dtype):
    """scores = xi_encoder(x_rows) @ v_enc.T, fused into one kernel.

    v_enc_pad is (B2, v_lane) with the padded columns exactly zero, so the padded
    contraction is exact; B2 is lane-padded for an unmasked output store."""
    B2 = v_enc_pad.shape[0]
    b2_pad = _round_up(B2, LANE)
    venc_t = v_enc_pad.T                                    # (v_lane, B2)
    if compute_dtype is not None:
        venc_t = venc_t.astype(compute_dtype)
        x_rows = x_rows.astype(compute_dtype)
    if b2_pad != B2:
        venc_t = jnp.pad(venc_t, ((0, 0), (0, b2_pad - B2)))
    scores = _fused_call(_mlp_score_kernel, x_rows, list(xi_weights) + [venc_t],
                         b2_pad, f32_work_cols=HID1 + HID2 + v_lane + b2_pad)
    return scores[:, :B2]


def add_one_hot(X0):
    B, F = X0.shape
    eye = jnp.eye(F, dtype=X0.dtype)
    eye_rep = jnp.broadcast_to(eye, (B, F, F))
    return jnp.concatenate([X0[:, :, None], eye_rep], axis=2)   # (B, F, F+1)


def get_single_marginal_scores(params, x0i_with_oh, V1, *, compute_dtype=None):
    # TODO(synk): estimate_MI_smile is not defined in the reference source; we return
    # the raw critic score matrix (x0i_encoded @ V1_encoded.T) instead of the SMILE MI.
    V = params["v_encoder"]["w3"].shape[1]
    v_lane = _round_up(V, LANE)
    vw = _prepare_encoder(params["v_encoder"], v_lane, compute_dtype)
    xw = _prepare_encoder(params["xi_encoder"], v_lane, compute_dtype)
    v_enc = _encoder_forward_padded(V1, vw, v_lane, compute_dtype)
    return _scores_from_padded_venc(x0i_with_oh, xw, v_enc, v_lane, compute_dtype)


def get_sum_scores(params, X0, V1, *, compute_dtype=None):
    """Sum over features of xi_encoder(x0i_with_oh) @ v_encoder(V1).T.

    v_encoder runs once (hoisted); all nf feature slices are flattened into a single
    fused MLP+score pallas_call; the feature reduction is a cheap XLA sum."""
    B, nf = X0.shape
    B2 = V1.shape[0]
    V = params["v_encoder"]["w3"].shape[1]
    v_lane = _round_up(V, LANE)
    vw = _prepare_encoder(params["v_encoder"], v_lane, compute_dtype)
    xw = _prepare_encoder(params["xi_encoder"], v_lane, compute_dtype)

    v_enc = _encoder_forward_padded(V1, vw, v_lane, compute_dtype)       # (B2, v_lane)
    X_flat = add_one_hot(X0).reshape(B * nf, nf + 1)                     # (B*nf, F+1)
    scores_flat = _scores_from_padded_venc(X_flat, xw, v_enc, v_lane,
                                           compute_dtype)                # (B*nf, B2)
    return scores_flat.reshape(B, nf, B2).sum(axis=1).astype(jnp.float32)


# ------------------------------------------------------------------- pure-JAX reference
def _ref_mlp(x, p):
    h1 = jnp.maximum(x @ p["w1"] + p["b1"], 0.0)
    h2 = jnp.maximum(h1 @ p["w2"] + p["b2"], 0.0)
    return h2 @ p["w3"] + p["b3"]


def _ref_sum_scores(params, X0, V1):
    X0_with_oh = add_one_hot(X0)
    v_enc = _ref_mlp(V1, params["v_encoder"])
    total = jnp.zeros((X0.shape[0], V1.shape[0]), jnp.float32)
    for i in range(X0.shape[1]):
        xi_enc = _ref_mlp(X0_with_oh[:, i], params["xi_encoder"])
        total = total + xi_enc @ v_enc.T
    return total


if __name__ == "__main__":
    key = jax.random.PRNGKey(0)
    V_dim, critic_output_dim, feature_num, batch = 8, 16, 4, 16

    key, kx0, kv1, kp = jax.random.split(key, 4)
    X0 = jax.random.normal(kx0, (batch, feature_num), jnp.float32)
    V1 = jax.random.normal(kv1, (batch, V_dim), jnp.float32)
    params = init_downward_smile_params(kp, V_dim, critic_output_dim, feature_num)

    ref = _ref_sum_scores(params, X0, V1)

    # f32 path (tight tolerance)
    out = jax.block_until_ready(get_sum_scores(params, X0, V1))
    assert out.shape == (batch, batch)
    assert jnp.allclose(out, ref, atol=1e-4, rtol=1e-4), "f32 mismatch vs reference"

    # bf16 compute path (f32 accumulation), looser tolerance
    out_bf16 = jax.block_until_ready(
        get_sum_scores(params, X0, V1, compute_dtype=jnp.bfloat16))
    assert out_bf16.shape == (batch, batch)
    assert jnp.allclose(out_bf16, ref, atol=5e-2, rtol=5e-2), "bf16 mismatch vs reference"

    print("KERNEL_OK")
</pallas_src>

<mosaic_0001>
module attributes {stable_mosaic.version = 11 : i64} {
  func.func @_mlp_kernel(%arg0: i32, %arg1: memref<16x8xf32, #tpu.memory_space<vmem>>, %arg2: memref<8x128xf32, #tpu.memory_space<vmem>>, %arg3: memref<1x128xf32, #tpu.memory_space<vmem>>, %arg4: memref<128x64xf32, #tpu.memory_space<vmem>>, %arg5: memref<1x64xf32, #tpu.memory_space<vmem>>, %arg6: memref<64x128xf32, #tpu.memory_space<vmem>>, %arg7: memref<1x128xf32, #tpu.memory_space<vmem>>, %arg8: memref<16x128xf32, #tpu.memory_space<vmem>>) attributes {dimension_semantics = [#tpu.dimension_semantics<parallel>], iteration_bounds = array<i64: 1>, scalar_prefetch = 0 : i64, scratch_operands = 0 : i64, tpu.core_type = #tpu.core_type<tc>, window_params = [{transform_indices = @transform_0, window_bounds = array<i64: 16, 8>}, {pipeline_mode = #tpu.pipeline_mode<synchronous>, transform_indices = @transform_1, window_bounds = array<i64: 8, 128>}, {pipeline_mode = #tpu.pipeline_mode<synchronous>, transform_indices = @transform_2, window_bounds = array<i64: 1, 128>}, {pipeline_mode = #tpu.pipeline_mode<synchronous>, transform_indices = @transform_3, window_bounds = array<i64: 128, 64>}, {pipeline_mode = #tpu.pipeline_mode<synchronous>, transform_indices = @transform_4, window_bounds = array<i64: 1, 64>}, {pipeline_mode = #tpu.pipeline_mode<synchronous>, transform_indices = @transform_5, window_bounds = array<i64: 64, 128>}, {pipeline_mode = #tpu.pipeline_mode<synchronous>, transform_indices = @transform_6, window_bounds = array<i64: 1, 128>}, {transform_indices = @transform_7, window_bounds = array<i64: 16, 128>}]} {
    %c0 = arith.constant 0 : index
    %c0_0 = arith.constant 0 : index
    %0 = vector.load %arg1[%c0, %c0_0] : memref<16x8xf32, #tpu.memory_space<vmem>>, vector<16x8xf32>
    %c0_1 = arith.constant 0 : index
    %c0_2 = arith.constant 0 : index
    %1 = vector.load %arg2[%c0_1, %c0_2] : memref<8x128xf32, #tpu.memory_space<vmem>>, vector<8x128xf32>
    %cst = arith.constant dense<0.000000e+00> : vector<16x128xf32>
    %2 = tpu.matmul %0, %1, %cst {dimension_numbers = #tpu.dot_dimension_numbers<[1], [0], [0], [1], [0, 0, 1, 1], [], []>} : vector<16x8xf32>, vector<8x128xf32>, vector<16x128xf32> -> vector<16x128xf32>
    %c0_3 = arith.constant 0 : index
    %c0_4 = arith.constant 0 : index
    %3 = vector.load %arg3[%c0_3, %c0_4] : memref<1x128xf32, #tpu.memory_space<vmem>>, vector<1x128xf32>
    %4 = vector.broadcast %3 : vector<1x128xf32> to vector<16x128xf32>
    %5 = arith.addf %2, %4 : vector<16x128xf32>
    %cst_5 = arith.constant 0.000000e+00 : f32
    %6 = vector.broadcast %cst_5 : f32 to vector<16x128xf32>
    %7 = arith.maximumf %5, %6 : vector<16x128xf32>
    %c0_6 = arith.constant 0 : index
    %c0_7 = arith.constant 0 : index
    %8 = vector.load %arg4[%c0_6, %c0_7] : memref<128x64xf32, #tpu.memory_space<vmem>>, vector<128x64xf32>
    %cst_8 = arith.constant dense<0.000000e+00> : vector<16x64xf32>
    %9 = tpu.matmul %7, %8, %cst_8 {dimension_numbers = #tpu.dot_dimension_numbers<[1], [0], [0], [1], [0, 0, 1, 1], [], []>} : vector<16x128xf32>, vector<128x64xf32>, vector<16x64xf32> -> vector<16x64xf32>
    %c0_9 = arith.constant 0 : index
    %c0_10 = arith.constant 0 : index
    %10 = vector.load %arg5[%c0_9, %c0_10] : memref<1x64xf32, #tpu.memory_space<vmem>>, vector<1x64xf32>
    %11 = vector.broadcast %10 : vector<1x64xf32> to vector<16x64xf32>
    %12 = arith.addf %9, %11 : vector<16x64xf32>
    %cst_11 = arith.constant 0.000000e+00 : f32
    %13 = vector.broadcast %cst_11 : f32 to vector<16x64xf32>
    %14 = arith.maximumf %12, %13 : vector<16x64xf32>
    %c0_12 = arith.constant 0 : index
    %c0_13 = arith.constant 0 : index
    %15 = vector.load %arg6[%c0_12, %c0_13] : memref<64x128xf32, #tpu.memory_space<vmem>>, vector<64x128xf32>
    %cst_14 = arith.constant dense<0.000000e+00> : vector<16x128xf32>
    %16 = tpu.matmul %14, %15, %cst_14 {dimension_numbers = #tpu.dot_dimension_numbers<[1], [0], [0], [1], [0, 0, 1, 1], [], []>} : vector<16x64xf32>, vector<64x128xf32>, vector<16x128xf32> -> vector<16x128xf32>
    %c0_15 = arith.constant 0 : index
    %c0_16 = arith.constant 0 : index
    %17 = vector.load %arg7[%c0_15, %c0_16] : memref<1x128xf32, #tpu.memory_space<vmem>>, vector<1x128xf32>
    %18 = vector.broadcast %17 : vector<1x128xf32> to vector<16x128xf32>
    %19 = arith.addf %16, %18 : vector<16x128xf32>
    %c0_17 = arith.constant 0 : index
    %c0_18 = arith.constant 0 : index
    %20 = vector.load %arg8[%c0_17, %c0_18] : memref<16x128xf32, #tpu.memory_space<vmem>>, vector<16x128xf32>
    tpu.vector_store %arg8[%c0_17, %c0_18], %19 {strides = array<i32>} : memref<16x128xf32, #tpu.memory_space<vmem>>, vector<16x128xf32>,
    return
  }
  func.func @transform_0(%arg0: i32) -> (i32, i32) {
    %c0_i32 = arith.constant 0 : i32
    %c0_i32_0 = arith.constant 0 : i32
    return %arg0, %c0_i32 : i32, i32
  }
  func.func @transform_1(%arg0: i32) -> (i32, i32) {
    %c0_i32 = arith.constant 0 : i32
    %c0_i32_0 = arith.constant 0 : i32
    %c0_i32_1 = arith.constant 0 : i32
    return %c0_i32, %c0_i32_0 : i32, i32
  }
  func.func @transform_2(%arg0: i32) -> (i32, i32) {
    %c0_i32 = arith.constant 0 : i32
    %c0_i32_0 = arith.constant 0 : i32
    %c0_i32_1 = arith.constant 0 : i32
    return %c0_i32, %c0_i32_0 : i32, i32
  }
  func.func @transform_3(%arg0: i32) -> (i32, i32) {
    %c0_i32 = arith.constant 0 : i32
    %c0_i32_0 = arith.constant 0 : i32
    %c0_i32_1 = arith.constant 0 : i32
    return %c0_i32, %c0_i32_0 : i32, i32
  }
  func.func @transform_4(%arg0: i32) -> (i32, i32) {
    %c0_i32 = arith.constant 0 : i32
    %c0_i32_0 = arith.constant 0 : i32
    %c0_i32_1 = arith.constant 0 : i32
    return %c0_i32, %c0_i32_0 : i32, i32
  }
  func.func @transform_5(%arg0: i32) -> (i32, i32) {
    %c0_i32 = arith.constant 0 : i32
    %c0_i32_0 = arith.constant 0 : i32
    %c0_i32_1 = arith.constant 0 : i32
    return %c0_i32, %c0_i32_0 : i32, i32
  }
  func.func @transform_6(%arg0: i32) -> (i32, i32) {
    %c0_i32 = arith.constant 0 : i32
    %c0_i32_0 = arith.constant 0 : i32
    %c0_i32_1 = arith.constant 0 : i32
    return %c0_i32, %c0_i32_0 : i32, i32
  }
  func.func @transform_7(%arg0: i32) -> (i32, i32) {
    %c0_i32 = arith.constant 0 : i32
    %c0_i32_0 = arith.constant 0 : i32
    return %arg0, %c0_i32 : i32, i32
  }
}

</mosaic_0001>

<bundles_post_ra>
// kernel: tpu_custom_call.1
= control target key start
LH: loop header
LB: loop body
LE: loop exit
PB: predicated region body
PF: predicated region fallthrough
CT: control target
= control target key end

     0   :  { %12 = vsyncpa [#allocation3], 0  ;;  %s926_s0 = inlined_call_operand.hbm [shape: f32[16,8], index: 0, kind: input, shape index: {}]   ;;  %s927_s1 = inlined_call_operand.hbm [shape: f32[8,128], index: 1, kind: input, shape index: {}]   ;;  %s928_s2 = inlined_call_operand.hbm [shape: f32[1,128], index: 2, kind: input, shape index: {}]   ;;  %s929_s3 = inlined_call_operand.hbm [shape: f32[128,64], index: 3, kind: input, shape index: {}]   ;;  %s930_s4 = inlined_call_operand.hbm [shape: f32[1,64], index: 4, kind: input, shape index: {}]   ;;  %s931_s5 = inlined_call_operand.hbm [shape: f32[64,128], index: 5, kind: input, shape index: {}]   ;;  %s932_s6 = inlined_call_operand.hbm [shape: f32[1,128], index: 6, kind: input, shape index: {}]   ;;  %s933_s7 = inlined_call_operand.hbm [shape: f32[16,128], index: 7, kind: output, shape index: {}]  }
   0x1   :  { %13 = vsyncpa [#allocation6], 0 }
   0x2   :  { %14 = vsyncpa [#allocation9], 0 }
   0x3   :  { %15 = vsyncpa [#allocation12], 0 }
   0x4   :  { %16 = vsyncpa [#allocation4], 0  ;;  %s768_s24 = smov [#allocation5]   ;;  %s582_s28 = scalar_lea.hbm %s927_s1, 128 }
   0x5   :  { %s35_s25 = sshll.u32 %s768_s24, 4  ;;  %p583_p0 = scmp.ne.s32.totalorder %s927_s1, %s582_s28  ;;  %s36_s25 = int_to_ptr.vmem [resolvable:$true] %s35_s25 }
   0x6   :  { %p586_p1 = scmp.lt.u32.totalorder %s582_s28, %s927_s1 }
   0x8   :  { %p588_p2 = pnand %p586_p1, %p583_p0 }
   0xa   :  { %591 = shalt.err (!%p588_p2)
}
   0xb   :  { %s592_s10 = scalar_lea.vmem %s36_s25, 128  ;;  %p597_p4 = scmp.lt.s32.totalorder %s36_s25, %s36_s25 }
   0xc   :  { %p593_p3 = scmp.ne.s32.totalorder %s36_s25, %s592_s10  ;;  %p598_p5 = scmp.lt.s32.totalorder %s592_s10, %s592_s10 }
   0xe   :  { %p599_p6 = por %p598_p5, %p597_p4 }
  0x10   :  { %p600_p7 = pnand %p599_p6, %p593_p3 }
  0x12   :  { %603 = shalt.err (!%p600_p7)
}
  0x13   :  { %38 = dma.hbm_to_vmem [thread:$0]  %s927_s1, 128, %s36_s25, [#allocation6]  }
  0x14   :  { %s769_s13 = smov [#allocation8]   ;;  %s770_s15 = smov [#allocation11]  }
  0x15   :  { %s54_s14 = sshll.u32 %s769_s13, 4  ;;  %s76_s16 = sshll.u32 %s770_s15, 4  ;;  %s55_s14 = int_to_ptr.vmem [resolvable:$true] %s54_s14  ;;  %s77_s16 = int_to_ptr.vmem [resolvable:$true] %s76_s16 }
  0x16   :  { %s604_s19 = scalar_lea.hbm %s929_s3, 2048 }
  0x17   :  { %p605_p8 = scmp.ne.s32.totalorder %s929_s3, %s604_s19  ;;  %p608_p9 = scmp.lt.u32.totalorder %s604_s19, %s929_s3 }
  0x19   :  { %p610_p10 = pnand %p608_p9, %p605_p8 }
  0x1b   :  { %613 = shalt.err (!%p610_p10)
}
  0x1c   :  { %s614_s1 = scalar_lea.vmem %s55_s14, 2048  ;;  %p619_p12 = scmp.lt.s32.totalorder %s55_s14, %s55_s14 }
  0x1d   :  { %p615_p11 = scmp.ne.s32.totalorder %s55_s14, %s614_s1  ;;  %p620_p13 = scmp.lt.s32.totalorder %s614_s1, %s614_s1 }
  0x1f   :  { %p621_p0 = por %p620_p13, %p619_p12 }
  0x21   :  { %p622_p1 = pnand %p621_p0, %p615_p11 }
  0x23   :  { %625 = shalt.err (!%p622_p1)
}
  0x24   :  { %s771_s24 = smov 128   ;;  %s772_s25 = smov 8  }
  0x25   :  { %60 = dma.hbm_to_vmem [thread:$0]  %s929_s3, 2048, %s55_s14, [#allocation9], %s771_s24, %s771_s24, %s772_s25  }
  0x26   :  { %s626_s30 = scalar_lea.hbm %s931_s5, 1024 }
  0x27   :  { %p627_p2 = scmp.ne.s32.totalorder %s931_s5, %s626_s30  ;;  %p630_p3 = scmp.lt.u32.totalorder %s626_s30, %s931_s5 }
  0x29   :  { %p632_p4 = pnand %p630_p3, %p627_p2 }
  0x2b   :  { %635 = shalt.err (!%p632_p4)
}
  0x2c   :  { %s636_s12 = scalar_lea.vmem %s77_s16, 1024  ;;  %p641_p6 = scmp.lt.s32.totalorder %s77_s16, %s77_s16 }
  0x2d   :  { %p637_p5 = scmp.ne.s32.totalorder %s77_s16, %s636_s12  ;;  %p642_p7 = scmp.lt.s32.totalorder %s636_s12, %s636_s12 }
  0x2f   :  { %p643_p8 = por %p642_p7, %p641_p6 }
  0x31   :  { %p644_p9 = pnand %p643_p8, %p637_p5 }
  0x33   :  { %647 = shalt.err (!%p644_p9)
}
  0x34   :  { %82 = dma.hbm_to_vmem [thread:$0]  %s931_s5, 1024, %s77_s16, [#allocation12], %s771_s24, %s771_s24, %s772_s25  }
  0x35   :  { %s773_s14 = smov [#allocation2]   ;;  %s774_s17 = smov [#allocation7]  }
  0x36   :  { %s22_s15 = sshll.u32 %s773_s14, 4  ;;  %s45_s18 = sshll.u32 %s774_s17, 4  ;;  %s23_s15 = int_to_ptr.vmem [resolvable:$true] %s22_s15  ;;  %s46_s18 = int_to_ptr.vmem [resolvable:$true] %s45_s18 }
  0x37   :  { %s648_s21 = scalar_lea.hbm %s926_s0, 256 }
  0x38   :  { %p649_p10 = scmp.ne.s32.totalorder %s926_s0, %s648_s21  ;;  %p652_p11 = scmp.lt.u32.totalorder %s648_s21, %s926_s0 }
  0x3a   :  { %p654_p12 = pnand %p652_p11, %p649_p10 }
  0x3c   :  { %657 = shalt.err (!%p654_p12)
}
  0x3d   :  { %s658_s5 = scalar_lea.vmem %s23_s15, 256  ;;  %p663_p0 = scmp.lt.s32.totalorder %s23_s15, %s23_s15 }
  0x3e   :  { %p659_p13 = scmp.ne.s32.totalorder %s23_s15, %s658_s5  ;;  %p664_p1 = scmp.lt.s32.totalorder %s658_s5, %s658_s5 }
  0x40   :  { %p665_p2 = por %p664_p1, %p663_p0 }
  0x42   :  { %p666_p3 = pnand %p665_p2, %p659_p13 }
  0x44   :  { %669 = shalt.err (!%p666_p3)
}
  0x45   :  { %28 = dma.hbm_to_vmem [thread:$0]  %s926_s0, 256, %s23_s15, [#allocation3], %s771_s24, %s771_s24, %s772_s25  }
  0x46   :  { %s670_s30 = scalar_lea.hbm %s928_s2, 16 }
  0x47   :  { %p671_p4 = scmp.ne.s32.totalorder %s928_s2, %s670_s30  ;;  %p674_p5 = scmp.lt.u32.totalorder %s670_s30, %s928_s2 }
  0x49   :  { %p676_p6 = pnand %p674_p5, %p671_p4 }
  0x4b   :  { %679 = shalt.err (!%p676_p6)
}
  0x4c   :  { %s680_s12 = scalar_lea.vmem %s46_s18, 16  ;;  %s684_s3 = scalar_lea.vmem %s46_s18, 32 }
  0x4d   :  { %p681_p7 = scmp.ne.s32.totalorder %s46_s18, %s680_s12  ;;  %p685_p8 = scmp.lt.s32.totalorder %s46_s18, %s46_s18 }
  0x4e   :  { %p686_p9 = scmp.lt.s32.totalorder %s684_s3, %s680_s12 }
  0x50   :  { %p687_p10 = por %p686_p9, %p685_p8 }
  0x52   :  { %p688_p11 = pnand %p687_p10, %p681_p7 }
  0x54   :  { %691 = shalt.err (!%p688_p11)
}
  0x55   :  { %48 = dma.hbm_to_vmem [thread:$0]  %s928_s2, 16, %s46_s18, [#allocation6]  }
  0x56   :  { %s775_s14 = smov [#allocation10]   ;;  %s776_s17 = smov [#allocation13]  }
  0x57   :  { %s67_s15 = sshll.u32 %s775_s14, 4  ;;  %s89_s19 = sshll.u32 %s776_s17, 4  ;;  %s68_s15 = int_to_ptr.vmem [resolvable:$true] %s67_s15  ;;  %s90_s19 = int_to_ptr.vmem [resolvable:$true] %s89_s19 }
  0x58   :  { %s692_s22 = scalar_lea.hbm %s930_s4, 16 }
  0x59   :  { %p693_p12 = scmp.ne.s32.totalorder %s930_s4, %s692_s22  ;;  %p696_p13 = scmp.lt.u32.totalorder %s692_s22, %s930_s4 }
  0x5b   :  { %p698_p0 = pnand %p696_p13, %p693_p12 }
  0x5d   :  { %701 = shalt.err (!%p698_p0)
}
  0x5e   :  { %s702_s2 = scalar_lea.vmem %s68_s15, 16  ;;  %s706_s18 = scalar_lea.vmem %s68_s15, 32 }
  0x5f   :  { %p703_p1 = scmp.ne.s32.totalorder %s68_s15, %s702_s2  ;;  %p707_p2 = scmp.lt.s32.totalorder %s68_s15, %s68_s15 }
  0x60   :  { %p708_p3 = scmp.lt.s32.totalorder %s706_s18, %s702_s2 }
  0x62   :  { %p709_p4 = por %p708_p3, %p707_p2 }
  0x64   :  { %p710_p5 = pnand %p709_p4, %p703_p1 }
  0x66   :  { %713 = shalt.err (!%p710_p5)
}
  0x67   :  { %70 = dma.hbm_to_vmem [thread:$0]  %s930_s4, 16, %s68_s15, [#allocation9]  }
  0x68   :  { %s714_s30 = scalar_lea.hbm %s932_s6, 16 }
  0x69   :  { %p715_p6 = scmp.ne.s32.totalorder %s932_s6, %s714_s30  ;;  %p718_p7 = scmp.lt.u32.totalorder %s714_s30, %s932_s6 }
  0x6b   :  { %p720_p8 = pnand %p718_p7, %p715_p6 }
  0x6d   :  { %723 = shalt.err (!%p720_p8)
}
  0x6e   :  { %s724_s12 = scalar_lea.vmem %s90_s19, 16  ;;  %s728_s3 = scalar_lea.vmem %s90_s19, 32 }
  0x6f   :  { %p725_p9 = scmp.ne.s32.totalorder %s90_s19, %s724_s12  ;;  %p729_p10 = scmp.lt.s32.totalorder %s90_s19, %s90_s19 }
  0x70   :  { %p730_p11 = scmp.lt.s32.totalorder %s728_s3, %s724_s12 }
  0x72   :  { %p731_p12 = por %p730_p11, %p729_p10 }
  0x74   :  { %p732_p13 = pnand %p731_p12, %p725_p9 }
  0x76   :  { %735 = shalt.err (!%p732_p13)
}
  0x77   :  { %92 = dma.hbm_to_vmem [thread:$0]  %s932_s6, 16, %s90_s19, [#allocation12]  }
  0x78   :  { %758 = dma.done.wait [#allocation3], 256  }
  0x79   :  { %759 = vsyncadd [#allocation3], 4294967040 }
  0x7a   :  { %760 = dma.done.wait [#allocation6], 144  }
  0x7b   :  { %761 = vsyncadd [#allocation6], 4294967152 }
  0x7c   :  { %762 = dma.done.wait [#allocation9], 2064  }
  0x7d   :  { %763 = vsyncadd [#allocation9], 4294965232 }
  0x7e   :  { %764 = dma.done.wait [#allocation12], 1040  }
  0x7f   :  { %765 = vsyncadd [#allocation12], 4294966256  ;;  %vm124_vm0 = vcmask 64512   ;;  %v116_v0 = vld [vmem:[#allocation5] sm:$0xff]  ;;  %v114_v1 = vld [vmem:[#allocation2] sm:$0xff]  ;;  %vm323_vm1 = vcmask 523264  }
  0x80   :  { %v115_v2 = vld [vmem:[#allocation2 + $0x8] sm:$0xff]  ;;  %465 = vmatprep.subr.mxu0 %v116_v0  ;;  %467 = vmatprep.mubr.msk.f32.mxu0 %vm124_vm0, %v114_v1  ;;  %v208_v3 = vld [vmem:[#allocation8] sm:$0xff]  ;;  %v211_v7 = vld [vmem:[#allocation8 + $0x18] sm:$0xff]  ;;  %s777_s6 = smov [#allocation14]  }
  0x81   :  { %v209_v4 = vld [vmem:[#allocation8 + $0x8] sm:$0xff]  ;;  %v210_v5 = vld [vmem:[#allocation8 + $0x10] sm:$0xff]  ;;  %466 = vmatpush3.msra.mxu0 %v116_v0  ;;  %v212_v9 = vld [vmem:[#allocation8 + $0x20] sm:$0xff]  ;;  %s412_s13 = sshll.u32 %s777_s6, 4  ;;  %s413_s13 = int_to_ptr.vmem [resolvable:$true] %s412_s13 }
  0x82   :  { %v524_v6 = vpack.c.bf16 %v209_v4, %v208_v3  ;;  %468 = vmatmul.mubr.msk.f32.vlgmr.msra.gmra.mrb[0].mxu0 %vm124_vm0, %v115_v2  ;;  %v528_v8 = vpack.c.bf16 %v211_v7, %v210_v5  ;;  %v213_v10 = vld [vmem:[#allocation8 + $0x28] sm:$0xff]  ;;  %v214_v12 = vld [vmem:[#allocation8 + $0x30] sm:$0xff]  ;;  %v215_v13 = vld [vmem:[#allocation8 + $0x38] sm:$0xff]  ;;  %s736_s14 = scalar_lea.vmem %s413_s13, 256  ;;  %p741_p1 = scmp.lt.s32.totalorder %s413_s13, %s413_s13 }
  0x83   :  { %v532_v11 = vpack.c.bf16 %v213_v10, %v212_v9  ;;  %v536_v14 = vpack.c.bf16 %v215_v13, %v214_v12  ;;  %v216_v15 = vld [vmem:[#allocation8 + $0x40] sm:$0xff]  ;;  %v217_v16 = vld [vmem:[#allocation8 + $0x48] sm:$0xff]  ;;  %v218_v18 = vld [vmem:[#allocation8 + $0x50] sm:$0xff]  ;;  %p737_p0 = scmp.ne.s32.totalorder %s413_s13, %s736_s14  ;;  %p742_p2 = scmp.lt.s32.totalorder %s736_s14, %s736_s14 }
  0x84   :  { %525 = vmatprep.subr.bf16.mxu1 %v524_v6  ;;  %v540_v17 = vpack.c.bf16 %v217_v16, %v216_v15  ;;  %v219_v19 = vld [vmem:[#allocation8 + $0x58] sm:$0xff]  ;;  %v220_v21 = vld [vmem:[#allocation8 + $0x60] sm:$0xff]  ;;  %v221_v22 = vld [vmem:[#allocation8 + $0x68] sm:$0xff] }
  0x85   :  { %527 = vmatpush3.bf16.msra.mxu1 %v524_v6  ;;  %v544_v20 = vpack.c.bf16 %v219_v19, %v218_v18  ;;  %v548_v23 = vpack.c.bf16 %v221_v22, %v220_v21  ;;  %v222_v24 = vld [vmem:[#allocation8 + $0x70] sm:$0xff]  ;;  %v223_v25 = vld [vmem:[#allocation8 + $0x78] sm:$0xff]  ;;  %v308_v27 = vld [vmem:[#allocation11] sm:$0xff]  ;;  %p743_p3 = por %p742_p2, %p741_p1 }
  0x86   :  { %529 = vmatprep.subr.bf16.mxu1 %v528_v8  ;;  %v552_v26 = vpack.c.bf16 %v223_v25, %v222_v24  ;;  %v309_v28 = vld [vmem:[#allocation11 + $0x8] sm:$0xff]  ;;  %v310_v29 = vld [vmem:[#allocation11 + $0x10] sm:$0xff]  ;;  %v311_v31 = vld [vmem:[#allocation11 + $0x18] sm:$0xff] }
  0x87   :  { %v556_v30 = vpack.c.bf16 %v309_v28, %v308_v27  ;;  %v560_v32 = vpack.c.bf16 %v311_v31, %v310_v29  ;;  %v312_v33 = vld [vmem:[#allocation11 + $0x20] sm:$0xff]  ;;  %v313_v34 = vld [vmem:[#allocation11 + $0x28] sm:$0xff]  ;;  %v427_v36 = vld [vmem:[#allocation7] ss:$0 sm:$0xff]  ;;  %p744_p4 = pnand %p743_p3, %p737_p0 }
  0x88   :  { %v564_v35 = vpack.c.bf16 %v313_v34, %v312_v33  ;;  %v314_v43 = vld [vmem:[#allocation11 + $0x30] sm:$0xff]  ;;  %v315_v44 = vld [vmem:[#allocation11 + $0x38] sm:$0xff]  ;;  %v431_v53 = vld [vmem:[#allocation13] ss:$0 sm:$0xff] }
  0x89   :  { %531 = vmatpush3.bf16.msra.mxu1 %v528_v8  ;;  %557 = vmatprep.subr.bf16.mxu0 %v556_v30  ;;  %v568_v45 = vpack.c.bf16 %v315_v44, %v314_v43  ;;  %v430_v46 = vld [vmem:[#allocation10] ss:$0 sm:$0xff] }
  0x8a   :  { %533 = vmatprep.subr.bf16.mxu1 %v532_v11  ;;  %559 = vmatpush3.bf16.msra.mxu0 %v556_v30 }
  0x8b   :  { %561 = vmatprep.subr.bf16.mxu0 %v560_v32 }
  0x8d   :  { %535 = vmatpush3.bf16.msra.mxu1 %v532_v11 }
  0x8e   :  { %537 = vmatprep.subr.bf16.mxu1 %v536_v14  ;;  %563 = vmatpush3.bf16.msra.mxu0 %v560_v32 }
  0x8f   :  { %565 = vmatprep.subr.bf16.mxu0 %v564_v35 }
  0x91   :  { %539 = vmatpush3.bf16.msra.mxu1 %v536_v14 }
  0x92   :  { %541 = vmatprep.subr.bf16.mxu1 %v540_v17  ;;  %567 = vmatpush3.bf16.msra.mxu0 %v564_v35 }
  0x93   :  { %569 = vmatprep.subr.bf16.mxu0 %v568_v45 }
  0x95   :  { %543 = vmatpush3.bf16.msra.mxu1 %v540_v17 }
  0x96   :  { %545 = vmatprep.subr.bf16.mxu1 %v544_v20  ;;  %571 = vmatpush3.bf16.msra.mxu0 %v568_v45 }
  0x99   :  { %547 = vmatpush3.bf16.msra.mxu1 %v544_v20 }
  0x9a   :  { %549 = vmatprep.subr.bf16.mxu1 %v548_v23 }
  0x9d   :  { %551 = vmatpush3.bf16.msra.mxu1 %v548_v23 }
  0x9e   :  { %553 = vmatprep.subr.bf16.mxu1 %v552_v26 }
  0xa1   :  { %555 = vmatpush3.bf16.msra.mxu1 %v552_v26 }
 0x155   :  { %v469_v37 = vpop.f32.mrb[0].mxu0 }
 0x156   :  { %v203_v38 = vadd.f32 %v469_v37, %v427_v36  ;;  %v197_v39 = vpop.f32.mrb[1].mxu0 }
 0x157   :  { %v198_v40 = vadd.f32 %v427_v36, %v197_v39 }
 0x158   :  { %v207_v42 = vmax.f32 %v203_v38, 0.0 }
 0x159   :  { %v206_v41 = vmax.f32 %v198_v40, 0.0 }
 0x15b   :  { %502 = vmatprep.mubr.f32.mxu1 %v206_v41 }
 0x15c   :  { %503 = vmatmul.mubr.f32.vlgmr.msra.gmra.mrb[0].mxu1 %v207_v42 }
 0x22f   :  { %v504_v47 = vpop.f32.mrb[0].mxu1 }
 0x230   :  { %v303_v48 = vadd.f32 %v504_v47, %v430_v46  ;;  %v297_v49 = vpop.f32.mrb[1].mxu1 }
 0x231   :  { %v298_v50 = vadd.f32 %v430_v46, %v297_v49 }
 0x232   :  { %v307_v52 = vmax.f32 %v303_v48, 0.0 }
 0x233   :  { %v306_v51 = vmax.f32 %v298_v50, 0.0 }
 0x235   :  { %521 = vmatprep.mubr.msk.f32.mxu0 %vm323_vm1, %v306_v51 }
 0x236   :  { %522 = vmatmul.mubr.msk.f32.vlgmr.msra.gmra.mrb[2].mxu0 %vm323_vm1, %v307_v52 }
 0x309   :  { %v523_v54 = vpop.f32.mrb[2].mxu0 }
 0x30a   :  { %v402_v55 = vadd.f32 %v523_v54, %v431_v53  ;;  %v396_v56 = vpop.f32.mrb[3].mxu0 }
 0x30b   :  { %v397_v57 = vadd.f32 %v431_v53, %v396_v56 }
 0x30c   :  { %406 = vst [vmem:[#allocation14 + $0x8] sm:$0xff] %v402_v55 }
 0x30d   :  { %405 = vst [vmem:[#allocation14] sm:$0xff] %v397_v57 }
 0x30e   :  { %747 = shalt.err (!%p744_p4)
}
 0x30f   :  { %s748_s19 = scalar_lea.hbm %s933_s7, 256 }
 0x310   :  { %p749_p5 = scmp.ne.s32.totalorder %s933_s7, %s748_s19  ;;  %p752_p6 = scmp.lt.u32.totalorder %s748_s19, %s933_s7 }
 0x312   :  { %p754_p7 = pnand %p752_p6, %p749_p5 }
 0x314   :  { %757 = shalt.err (!%p754_p7)
}
 0x315   :  { %418 = dma.vmem_to_hbm [thread:$0]  %s413_s13, 256, %s933_s7, [#allocation4], %s771_s24, %s771_s24, %s772_s25  }
 0x316   :  { %766 = dma.done.wait [#allocation4], 256  }
 0x317   :  { %767 = vsyncadd [#allocation4], 4294967040 }
 0x318   :  { %422 = vsyncpa [#allocation3], 1 }
 0x319   :  { %423 = vsyncpa [#allocation6], 1 }
 0x31a   :  { %424 = vsyncpa [#allocation9], 1 }
 0x31b   :  { %425 = vsyncpa [#allocation12], 1 }
 0x31c   :  { %426 = vsyncpa [#allocation4], 1 }

</bundles_post_ra>
